<compile_context>
chip_gen: v6e
topology: v6e:2x2x1
jax: 0.10.0
libtpu: 0.0.40
codegen_flags: <defaults>
</compile_context>

<pallas_src>
import jax
import jax.numpy as jnp
from jax.experimental import pallas as pl
from jax.experimental.pallas import tpu as pltpu


def _round_up(x, m):
    return ((x + m - 1) // m) * m


def _protein_embedding_kernel(t_idx_ref, c_idx_ref, Tt_ref, Ct_ref, out_ref,
                              t_acc_ref, c_acc_ref):
    """Grid step (i, k): gather the k-th vocab block for TN pairs, accumulate.

    t_idx_ref / c_idx_ref : (1, TN)   int32    index tile (pair tile i)
    Tt_ref / Ct_ref       : (Dp, Vk)  bfloat16 transposed table block k
    out_ref               : (1, TN)   float32  lane-dense output row (tile i)
    t_acc_ref / c_acc_ref : (Dp, TN)  float32  gathered-embedding accumulators
    """
    k = pl.program_id(1)
    Vk = Tt_ref.shape[1]
    TN = t_idx_ref.shape[-1]
    cdtype = Tt_ref.dtype

    @pl.when(k == 0)
    def _():
        t_acc_ref[...] = jnp.zeros_like(t_acc_ref)
        c_acc_ref[...] = jnp.zeros_like(c_acc_ref)

    # Indices relative to this vocab block; out-of-block indices give an
    # all-zero one-hot column, so each pair contributes from exactly one block.
    base = k * Vk
    t_loc = t_idx_ref[...] - base                         # (1, TN)
    c_loc = c_idx_ref[...] - base                         # (1, TN)

    # One-hot with the vocab block on sublanes and TN on lanes, so the matmul
    # result is already (Dp, TN) with TN lane-dense — no relayout before store.
    vocab_iota = jax.lax.broadcasted_iota(jnp.int32, (Vk, TN), 0)
    t_onehot = (vocab_iota == t_loc).astype(cdtype)       # (Vk, TN)
    c_onehot = (vocab_iota == c_loc).astype(cdtype)       # (Vk, TN)

    # Embedding gather on the MXU: (Dp, Vk) @ (Vk, TN) -> (Dp, TN), f32 acc.
    t_acc_ref[...] += jnp.dot(Tt_ref[...], t_onehot,
                              preferred_element_type=jnp.float32)
    c_acc_ref[...] += jnp.dot(Ct_ref[...], c_onehot,
                              preferred_element_type=jnp.float32)

    @pl.when(k == pl.num_programs(1) - 1)
    def _():
        # Row-wise dot product: elementwise multiply + sublane reduce over Dp,
        # writing the lane-dense (1, TN) output row.
        out_ref[...] = jnp.sum(t_acc_ref[...] * c_acc_ref[...],
                               axis=0, keepdims=True)


def prepare_tables(T_w, C_w, *, vk=None, compute_dtype=jnp.bfloat16):
    """Pad + transpose + cast the embedding tables once (hoistable).

    Returns a dict usable as `prepared=` for protein_embedding_forward so the
    per-call path skips the full-table relayout when weights are static.
    """
    V, D = int(T_w.shape[0]), int(T_w.shape[1])
    if vk is None:
        vk = 1024                       # vocab-contraction block (lanes of LHS)
    Vk = max(128, min(_round_up(int(vk), 128), _round_up(V, 128)))
    Vp = _round_up(V, Vk)               # padded vocab (multiple of Vk and 128)
    Dp = _round_up(D, 16)               # bf16 sublane packing of the table rows

    # (V, D) -> pad -> (Vp, Dp) -> transpose -> (Dp, Vp); padded rows/cols are
    # zero so the computation is exact.  bf16 one-hot values {0,1} are exact;
    # table entries take one bf16 rounding, accumulation stays f32.
    Tt = jnp.pad(T_w, ((0, Vp - V), (0, Dp - D))).T.astype(compute_dtype)
    Ct = jnp.pad(C_w, ((0, Vp - V), (0, Dp - D))).T.astype(compute_dtype)
    return dict(Tt=Tt, Ct=Ct, V=V, D=D, Vp=Vp, Dp=Dp, Vk=Vk, dtype=compute_dtype)


def protein_embedding_forward(t_kmer, c_kmer, label, T_w=None, C_w=None, *,
                              tn=None, vk=None, compute_dtype=jnp.bfloat16,
                              prepared=None):
    """Pallas implementation of ProteinEmbedding.forward.

    t_kmer, c_kmer: (N,) integer indices into the vocab.
    label:          (N,) — unused (matches the PyTorch forward).
    T_w, C_w:       (V, D) float32 embedding tables (or pass `prepared=`).
    Returns:        (N,) float32.

    NOTE: out-of-range / negative indices yield 0 (all-zero one-hot) instead of
    raising like nn.Embedding; padded batch entries alias vocab row 0 and are
    sliced off at the end.
    """
    del label  # unused in forward, same as the PyTorch module
    if prepared is None:
        prepared = prepare_tables(T_w, C_w, vk=vk, compute_dtype=compute_dtype)
    Tt, Ct = prepared["Tt"], prepared["Ct"]
    Vp, Dp, Vk = prepared["Vp"], prepared["Dp"], prepared["Vk"]
    cdtype = prepared["dtype"]
    itemsize = jnp.dtype(cdtype).itemsize

    N = int(t_kmer.shape[0])
    Kb = Vp // Vk

    # --- Pair-tile size along N: auto-scale with vocab so each grid step does
    # enough MXU work, while the (Vk, tn) one-hot stays small.  Always a
    # multiple of 128 so the output row is lane-dense; don't over-pad tiny N.
    if tn is None:
        if Vp <= 1024:
            tn = 2048
        elif Vp <= 8192:
            tn = 1024
        else:
            tn = 512
    tn = max(128, min(_round_up(int(tn), 128), _round_up(N, 128)))

    pad = (-N) % tn
    Np = N + pad
    G = Np // tn

    # Padded entries index row 0 and are sliced off at the end.
    t_idx = jnp.pad(t_kmer.astype(jnp.int32), (0, pad)).reshape(G, tn)
    c_idx = jnp.pad(c_kmer.astype(jnp.int32), (0, pad)).reshape(G, tn)

    # --- Generation-aware VMEM budget (blocked working set, with headroom). ---
    table_bytes = 2 * 2 * Dp * Vk * itemsize        # 2 tables, double-buffered blocks
    onehot_bytes = Vk * tn * (4 + 2 * itemsize)     # int32 iota + two one-hots
    acc_bytes = 2 * Dp * tn * 4                     # the two f32 accumulators
    tmp_bytes = 3 * Dp * tn * 4                     # matmul results + product
    io_bytes = 3 * 2 * tn * 4                       # index/output blocks (x2 buf)
    vmem_limit = int(1.3 * (table_bytes + onehot_bytes + acc_bytes
                            + tmp_bytes + io_bytes)) + (2 << 20)
    try:
        vmem_cap = int(pltpu.get_tpu_info().vmem_capacity_bytes)
    except Exception:
        vmem_cap = 64 << 20            # assume the smallest (v7x per-TC) VMEM
    vmem_limit = max(16 << 20, min(vmem_limit, int(0.70 * vmem_cap)))

    cost = pl.CostEstimate(
        flops=int(2 * 2 * Np * Vp * Dp + 3 * Np * Dp),
        transcendentals=0,
        bytes_accessed=int(G * 2 * Dp * Vp * itemsize + 2 * Np * 4 + Np * 4),
    )

    out2 = pl.pallas_call(
        _protein_embedding_kernel,
        out_shape=jax.ShapeDtypeStruct((G, tn), jnp.float32),
        grid_spec=pltpu.PrefetchScalarGridSpec(
            num_scalar_prefetch=0,
            grid=(G, Kb),                                   # reduction axis last
            in_specs=[
                pl.BlockSpec((1, tn), lambda i, k: (i, 0)),   # target index tile
                pl.BlockSpec((1, tn), lambda i, k: (i, 0)),   # context index tile
                pl.BlockSpec((Dp, Vk), lambda i, k: (0, k)),  # target table block
                pl.BlockSpec((Dp, Vk), lambda i, k: (0, k)),  # context table block
            ],
            out_specs=pl.BlockSpec((1, tn), lambda i, k: (i, 0)),
            scratch_shapes=[
                pltpu.VMEM((Dp, tn), jnp.float32),            # t-embedding acc
                pltpu.VMEM((Dp, tn), jnp.float32),            # c-embedding acc
            ],
        ),
        compiler_params=pltpu.CompilerParams(
            dimension_semantics=("parallel", "arbitrary"),
            vmem_limit_bytes=vmem_limit,
        ),
        cost_estimate=cost,
    )(t_idx, c_idx, Tt, Ct)

    return out2.reshape(-1)[:N]


if __name__ == "__main__":
    # Small, deterministic synthetic setup (stand-in for the vocab built from
    # the protein k-mer file; no file I/O here).
    key = jax.random.PRNGKey(0)

    def run_case(vocab_size, embed_dim, batch, **kw):
        k_t, k_c, k_ti, k_ci = jax.random.split(
            jax.random.fold_in(key, vocab_size), 4)
        # nn.Embedding default init ~ N(0, 1)
        T_w = jax.random.normal(k_t, (vocab_size, embed_dim), dtype=jnp.float32)
        C_w = jax.random.normal(k_c, (vocab_size, embed_dim), dtype=jnp.float32)
        t_kmer = jax.random.randint(k_ti, (batch,), 0, vocab_size, dtype=jnp.int32)
        c_kmer = jax.random.randint(k_ci, (batch,), 0, vocab_size, dtype=jnp.int32)
        label = jnp.ones((batch,), dtype=jnp.float32)   # unused in forward

        out = protein_embedding_forward(t_kmer, c_kmer, label, T_w, C_w, **kw)
        out = jax.block_until_ready(out)

        # Reference 1: exact model of the kernel math (bf16-rounded tables,
        # f32 multiply + accumulate).
        Tq = T_w.astype(jnp.bfloat16).astype(jnp.float32)
        Cq = C_w.astype(jnp.bfloat16).astype(jnp.float32)
        ref_bf16 = jnp.sum(Tq[t_kmer] * Cq[c_kmer], axis=1)
        # Reference 2: full-f32 PyTorch-equivalent forward (loose tolerance —
        # only differs by the single bf16 rounding of the table entries).
        ref_f32 = jnp.sum(T_w[t_kmer] * C_w[c_kmer], axis=1)

        assert out.shape == (batch,), out.shape
        assert jnp.allclose(out, ref_bf16, atol=1e-4, rtol=1e-4), (out, ref_bf16)
        assert jnp.allclose(out, ref_f32, atol=5e-1, rtol=5e-2), (out, ref_f32)

    # Case 1: tiny config — single vocab block (Kb=1), single pair tile (G=1).
    run_case(vocab_size=64, embed_dim=32, batch=16)
    # Case 2: exercises the blocked vocab contraction (Kb=3), multiple pair
    # tiles (G>1), batch padding, and the spec's embedding_dim=100 (Dp padding).
    run_case(vocab_size=300, embed_dim=100, batch=300, vk=128, tn=128)

    print("KERNEL_OK")
</pallas_src>

<mosaic_0001>
module attributes {stable_mosaic.version = 11 : i64} {
  func.func @_protein_embedding_kernel(%arg0: i32, %arg1: i32, %arg2: memref<1x128xi32, #tpu.memory_space<vmem>>, %arg3: memref<1x128xi32, #tpu.memory_space<vmem>>, %arg4: memref<32x128xbf16, #tpu.memory_space<vmem>>, %arg5: memref<32x128xbf16, #tpu.memory_space<vmem>>, %arg6: memref<1x128xf32, #tpu.memory_space<vmem>>, %arg7: memref<32x128xf32, #tpu.memory_space<vmem>>, %arg8: memref<32x128xf32, #tpu.memory_space<vmem>>) attributes {dimension_semantics = [#tpu.dimension_semantics<parallel>, #tpu.dimension_semantics<arbitrary>], iteration_bounds = array<i64: 1, 1>, scalar_prefetch = 0 : i64, scratch_operands = 2 : i64, tpu.core_type = #tpu.core_type<tc>, window_params = [{transform_indices = @transform_0, window_bounds = array<i64: 1, 128>}, {transform_indices = @transform_1, window_bounds = array<i64: 1, 128>}, {transform_indices = @transform_2, window_bounds = array<i64: 32, 128>}, {transform_indices = @transform_3, window_bounds = array<i64: 32, 128>}, {transform_indices = @transform_4, window_bounds = array<i64: 1, 128>}]} {
    %c0_i32 = arith.constant 0 : i32
    %0 = arith.cmpi eq, %arg1, %c0_i32 : i32
    %1 = arith.extui %0 : i1 to i32
    %c0_i32_0 = arith.constant 0 : i32
    %2 = arith.cmpi ne, %1, %c0_i32_0 : i32
    scf.if %2 {
      %cst_19 = arith.constant 0.000000e+00 : f32
      %34 = vector.broadcast %cst_19 : f32 to vector<32x128xf32>
      %c0_20 = arith.constant 0 : index
      %c0_21 = arith.constant 0 : index
      %35 = vector.load %arg7[%c0_20, %c0_21] : memref<32x128xf32, #tpu.memory_space<vmem>>, vector<32x128xf32>
      tpu.vector_store %arg7[%c0_20, %c0_21], %34 {strides = array<i32>} : memref<32x128xf32, #tpu.memory_space<vmem>>, vector<32x128xf32>,
      %cst_22 = arith.constant 0.000000e+00 : f32
      %36 = vector.broadcast %cst_22 : f32 to vector<32x128xf32>
      %c0_23 = arith.constant 0 : index
      %c0_24 = arith.constant 0 : index
      %37 = vector.load %arg8[%c0_23, %c0_24] : memref<32x128xf32, #tpu.memory_space<vmem>>, vector<32x128xf32>
      tpu.vector_store %arg8[%c0_23, %c0_24], %36 {strides = array<i32>} : memref<32x128xf32, #tpu.memory_space<vmem>>, vector<32x128xf32>,
    } else {
    }
    %c128_i32 = arith.constant 128 : i32
    %3 = arith.muli %arg1, %c128_i32 : i32
    %c0 = arith.constant 0 : index
    %c0_1 = arith.constant 0 : index
    %4 = vector.load %arg2[%c0, %c0_1] : memref<1x128xi32, #tpu.memory_space<vmem>>, vector<1x128xi32>
    %5 = vector.broadcast %3 : i32 to vector<1x128xi32>
    %6 = arith.subi %4, %5 : vector<1x128xi32>
    %c0_2 = arith.constant 0 : index
    %c0_3 = arith.constant 0 : index
    %7 = vector.load %arg3[%c0_2, %c0_3] : memref<1x128xi32, #tpu.memory_space<vmem>>, vector<1x128xi32>
    %8 = vector.broadcast %3 : i32 to vector<1x128xi32>
    %9 = arith.subi %7, %8 : vector<1x128xi32>
    %10 = tpu.iota {dimensions = array<i32: 0>} : vector<128x128xi32>
    %11 = vector.broadcast %6 : vector<1x128xi32> to vector<128x128xi32>
    %12 = arith.cmpi eq, %10, %11 : vector<128x128xi32>
    %13 = arith.extui %12 : vector<128x128xi1> to vector<128x128xi32>
    %14 = arith.sitofp %13 : vector<128x128xi32> to vector<128x128xf32>
    %15 = arith.truncf %14 : vector<128x128xf32> to vector<128x128xbf16>
    %16 = vector.broadcast %9 : vector<1x128xi32> to vector<128x128xi32>
    %17 = arith.cmpi eq, %10, %16 : vector<128x128xi32>
    %18 = arith.extui %17 : vector<128x128xi1> to vector<128x128xi32>
    %19 = arith.sitofp %18 : vector<128x128xi32> to vector<128x128xf32>
    %20 = arith.truncf %19 : vector<128x128xf32> to vector<128x128xbf16>
    %c0_4 = arith.constant 0 : index
    %c0_5 = arith.constant 0 : index
    %21 = vector.load %arg7[%c0_4, %c0_5] : memref<32x128xf32, #tpu.memory_space<vmem>>, vector<32x128xf32>
    %c0_6 = arith.constant 0 : index
    %c0_7 = arith.constant 0 : index
    %22 = vector.load %arg4[%c0_6, %c0_7] : memref<32x128xbf16, #tpu.memory_space<vmem>>, vector<32x128xbf16>
    %cst = arith.constant dense<0.000000e+00> : vector<32x128xf32>
    %23 = tpu.matmul %22, %15, %cst {dimension_numbers = #tpu.dot_dimension_numbers<[1], [0], [0], [1], [0, 0, 1, 1], [], []>} : vector<32x128xbf16>, vector<128x128xbf16>, vector<32x128xf32> -> vector<32x128xf32>
    %24 = arith.addf %21, %23 : vector<32x128xf32>
    %c0_8 = arith.constant 0 : index
    %c0_9 = arith.constant 0 : index
    %25 = vector.load %arg7[%c0_8, %c0_9] : memref<32x128xf32, #tpu.memory_space<vmem>>, vector<32x128xf32>
    tpu.vector_store %arg7[%c0_8, %c0_9], %24 {strides = array<i32>} : memref<32x128xf32, #tpu.memory_space<vmem>>, vector<32x128xf32>,
    %c0_10 = arith.constant 0 : index
    %c0_11 = arith.constant 0 : index
    %26 = vector.load %arg8[%c0_10, %c0_11] : memref<32x128xf32, #tpu.memory_space<vmem>>, vector<32x128xf32>
    %c0_12 = arith.constant 0 : index
    %c0_13 = arith.constant 0 : index
    %27 = vector.load %arg5[%c0_12, %c0_13] : memref<32x128xbf16, #tpu.memory_space<vmem>>, vector<32x128xbf16>
    %cst_14 = arith.constant dense<0.000000e+00> : vector<32x128xf32>
    %28 = tpu.matmul %27, %20, %cst_14 {dimension_numbers = #tpu.dot_dimension_numbers<[1], [0], [0], [1], [0, 0, 1, 1], [], []>} : vector<32x128xbf16>, vector<128x128xbf16>, vector<32x128xf32> -> vector<32x128xf32>
    %29 = arith.addf %26, %28 : vector<32x128xf32>
    %c0_15 = arith.constant 0 : index
    %c0_16 = arith.constant 0 : index
    %30 = vector.load %arg8[%c0_15, %c0_16] : memref<32x128xf32, #tpu.memory_space<vmem>>, vector<32x128xf32>
    tpu.vector_store %arg8[%c0_15, %c0_16], %29 {strides = array<i32>} : memref<32x128xf32, #tpu.memory_space<vmem>>, vector<32x128xf32>,
    %c0_i32_17 = arith.constant 0 : i32
    %31 = arith.cmpi eq, %arg1, %c0_i32_17 : i32
    %32 = arith.extui %31 : i1 to i32
    %c0_i32_18 = arith.constant 0 : i32
    %33 = arith.cmpi ne, %32, %c0_i32_18 : i32
    scf.if %33 {
      %c0_19 = arith.constant 0 : index
      %c0_20 = arith.constant 0 : index
      %34 = vector.load %arg7[%c0_19, %c0_20] : memref<32x128xf32, #tpu.memory_space<vmem>>, vector<32x128xf32>
      %c0_21 = arith.constant 0 : index
      %c0_22 = arith.constant 0 : index
      %35 = vector.load %arg8[%c0_21, %c0_22] : memref<32x128xf32, #tpu.memory_space<vmem>>, vector<32x128xf32>
      %36 = arith.mulf %34, %35 : vector<32x128xf32>
      %cst_23 = arith.constant dense<0.000000e+00> : vector<128xf32>
      %37 = vector.multi_reduction <add>, %36, %cst_23 [0] : vector<32x128xf32> to vector<128xf32>
      %38 = vector.shape_cast %37 : vector<128xf32> to vector<1x128xf32>
      %c0_24 = arith.constant 0 : index
      %c0_25 = arith.constant 0 : index
      %39 = vector.load %arg6[%c0_24, %c0_25] : memref<1x128xf32, #tpu.memory_space<vmem>>, vector<1x128xf32>
      tpu.vector_store %arg6[%c0_24, %c0_25], %38 {strides = array<i32>} : memref<1x128xf32, #tpu.memory_space<vmem>>, vector<1x128xf32>,
    } else {
    }
    return
  }
  func.func @transform_0(%arg0: i32, %arg1: i32) -> (i32, i32) {
    %c0_i32 = arith.constant 0 : i32
    %c0_i32_0 = arith.constant 0 : i32
    return %arg0, %c0_i32 : i32, i32
  }
  func.func @transform_1(%arg0: i32, %arg1: i32) -> (i32, i32) {
    %c0_i32 = arith.constant 0 : i32
    %c0_i32_0 = arith.constant 0 : i32
    return %arg0, %c0_i32 : i32, i32
  }
  func.func @transform_2(%arg0: i32, %arg1: i32) -> (i32, i32) {
    %c0_i32 = arith.constant 0 : i32
    %c0_i32_0 = arith.constant 0 : i32
    return %c0_i32, %arg1 : i32, i32
  }
  func.func @transform_3(%arg0: i32, %arg1: i32) -> (i32, i32) {
    %c0_i32 = arith.constant 0 : i32
    %c0_i32_0 = arith.constant 0 : i32
    return %c0_i32, %arg1 : i32, i32
  }
  func.func @transform_4(%arg0: i32, %arg1: i32) -> (i32, i32) {
    %c0_i32 = arith.constant 0 : i32
    %c0_i32_0 = arith.constant 0 : i32
    return %arg0, %c0_i32 : i32, i32
  }
}

</mosaic_0001>

<bundles_post_ra>
// kernel: tpu_custom_call.1
= control target key start
LH: loop header
LB: loop body
LE: loop exit
PB: predicated region body
PF: predicated region fallthrough
CT: control target
= control target key end

     0   :  { %9 = vsyncpa [#allocation5], 0  ;;  %s829_s0 = inlined_call_operand.hbm [shape: s32[1,128], index: 0, kind: input, shape index: {}]   ;;  %s830_s1 = inlined_call_operand.vmem [shape: s32[1,128], index: 1, kind: input, shape index: {}]   ;;  %s831_s2 = inlined_call_operand.hbm [shape: bf16[32,128], index: 2, kind: input, shape index: {}]   ;;  %s832_s3 = inlined_call_operand.hbm [shape: bf16[32,128], index: 3, kind: input, shape index: {}]   ;;  %s833_s4 = inlined_call_operand.hbm [shape: f32[1,128], index: 4, kind: output, shape index: {}]  }
   0x1   :  { %10 = vsyncpa [#allocation8], 0 }
   0x2   :  { %11 = vsyncpa [#allocation6], 0  ;;  %s635_s15 = smov [#allocation7]  }
   0x3   :  { %s29_s16 = sshll.u32 %s635_s15, 4  ;;  %s30_s16 = int_to_ptr.vmem [resolvable:$true] %s29_s16 }
   0x4   :  { %s557_s17 = scalar_lea.vmem %s30_s16, 256  ;;  %p562_p1 = scmp.lt.s32.totalorder %s30_s16, %s30_s16 }
   0x5   :  { %p558_p0 = scmp.ne.s32.totalorder %s30_s16, %s557_s17  ;;  %p563_p2 = scmp.lt.s32.totalorder %s557_s17, %s557_s17 }
   0x7   :  { %p564_p3 = por %p563_p2, %p562_p1 }
   0x9   :  { %p565_p4 = pnand %p564_p3, %p558_p0 }
   0xb   :  { %568 = shalt.err (!%p565_p4)
}
   0xc   :  { %s636_s18 = smov 64   ;;  %s637_s19 = smov 4  }
   0xd   :  { %35 = dma.hbm_to_vmem [thread:$0]  %s831_s2, 256, %s30_s16, [#allocation8], %s636_s18, %s636_s18, %s637_s19  }
   0xe   :  { %s638_s22 = smov [#allocation4]   ;;  %s639_s24 = smov [#allocation9]  }
   0xf   :  { %s18_s23 = sshll.u32 %s638_s22, 4  ;;  %s41_s25 = sshll.u32 %s639_s24, 4  ;;  %s19_s23 = int_to_ptr.vmem [resolvable:$true] %s18_s23  ;;  %s42_s25 = int_to_ptr.vmem [resolvable:$true] %s41_s25 }
  0x10   :  { %s577_s26 = scalar_lea.vmem %s19_s23, 16  ;;  %s581_s27 = scalar_lea.vmem %s19_s23, 32 }
  0x11   :  { %p578_p5 = scmp.ne.s32.totalorder %s19_s23, %s577_s26  ;;  %p582_p6 = scmp.lt.s32.totalorder %s19_s23, %s19_s23 }
  0x12   :  { %p583_p7 = scmp.lt.s32.totalorder %s581_s27, %s577_s26 }
  0x14   :  { %p584_p8 = por %p583_p7, %p582_p6 }
  0x16   :  { %p585_p9 = pnand %p584_p8, %p578_p5 }
  0x18   :  { %588 = shalt.err (!%p585_p9)
}
  0x19   :  { %21 = dma.hbm_to_vmem [thread:$0]  %s829_s0, 16, %s19_s23, [#allocation5]  }
  0x1a   :  { %s597_s30 = scalar_lea.vmem %s42_s25, 256  ;;  %p602_p11 = scmp.lt.s32.totalorder %s42_s25, %s42_s25 }
  0x1b   :  { %p598_p10 = scmp.ne.s32.totalorder %s42_s25, %s597_s30  ;;  %p603_p12 = scmp.lt.s32.totalorder %s597_s30, %s597_s30 }
  0x1d   :  { %p604_p13 = por %p603_p12, %p602_p11 }
  0x1f   :  { %p605_p0 = pnand %p604_p13, %p598_p10 }
  0x21   :  { %608 = shalt.err (!%p605_p0)
}
  0x22   :  { %47 = dma.hbm_to_vmem [thread:$0]  %s832_s3, 256, %s42_s25, [#allocation8], %s636_s18, %s636_s18, %s637_s19  }
  0x23   :  { %629 = dma.done.wait [#allocation5], 16  }
  0x24   :  { %630 = vsyncadd [#allocation5], 4294967280 }
  0x25   :  { %631 = dma.done.wait [#allocation8], 512  }
  0x26   :  { %632 = vsyncadd [#allocation8], 4294966784  ;;  %v76_v0 = vlaneseq  ;;  %v684_v8 = vld [vmem:[#allocation4] ss:$0 sm:$0xff]  ;;  %v640_v10 = vmov 1.0|1.0  }
  0x27   :  { %v689_v9 = vld [vmem:[%s830_s1] ss:$0 sm:$0xff]  ;;  %v545_v13 = vld [vmem:[#allocation7] sm:$0xff]   ;;  %v546_v15 = vld [vmem:[#allocation9] sm:$0xff]   ;;  %s641_s1 = smov [#allocation10]  }
  0x28   :  { %v676_v1 = vshrl.u32 %v76_v0, 7  ;;  %514 = vmatprep.mubr.bf16.mxu0 %v545_v13  ;;  %534 = vmatprep.mubr.bf16.mxu1 %v546_v15  ;;  %v547_v29 = vld [vmem:[#allocation7 + $0x8] sm:$0xff]   ;;  %v548_v30 = vld [vmem:[#allocation9 + $0x8] sm:$0xff]   ;;  %s398_s6 = sshll.u32 %s641_s1, 4  ;;  %s399_s6 = int_to_ptr.vmem [resolvable:$true] %s398_s6 }
  0x29   :  { %s609_s7 = scalar_lea.vmem %s399_s6, 16  ;;  %s613_s8 = scalar_lea.vmem %s399_s6, 32 }
  0x2a   :  { %v91_v2 = vadd.s32 112, %v676_v1  ;;  %v92_v3 = vadd.s32 120, %v676_v1  ;;  %v89_v4 = vadd.s32 96, %v676_v1  ;;  %v90_v5 = vadd.s32 104, %v676_v1  ;;  %p610_p1 = scmp.ne.s32.totalorder %s399_s6, %s609_s7  ;;  %p614_p2 = scmp.lt.s32.totalorder %s399_s6, %s399_s6 }
  0x2b   :  { %v87_v6 = vadd.s32 80, %v676_v1  ;;  %v88_v7 = vadd.s32 88, %v676_v1  ;;  %v85_v11 = vadd.s32 64, %v676_v1  ;;  %v86_v12 = vadd.s32 72, %v676_v1  ;;  %p615_p3 = scmp.lt.s32.totalorder %s613_s8, %s609_s7 }
  0x2c   :  { %vm111_vm0 = vcmp.eq.s32.totalorder %v91_v2, %v684_v8  ;;  %vm112_vm1 = vcmp.eq.s32.totalorder %v92_v3, %v684_v8  ;;  %vm171_vm2 = vcmp.eq.s32.totalorder %v91_v2, %v689_v9  ;;  %vm172_vm3 = vcmp.eq.s32.totalorder %v92_v3, %v689_v9 }
  0x2d   :  { %vm444_vm4 = vmpackc.low %vm112_vm1, %vm111_vm0  ;;  %vm109_vm5 = vcmp.eq.s32.totalorder %v89_v4, %v684_v8  ;;  %vm110_vm6 = vcmp.eq.s32.totalorder %v90_v5, %v684_v8  ;;  %vm169_vm7 = vcmp.eq.s32.totalorder %v89_v4, %v689_v9  ;;  %vm170_vm8 = vcmp.eq.s32.totalorder %v90_v5, %v689_v9  ;;  %p616_p4 = por %p615_p3, %p614_p2 }
  0x2e   :  { %498 = vmatprep.subr.msk.bf16.mxu0 %vm444_vm4, %v640_v10  ;;  %vm462_vm9 = vmpackc.low %vm172_vm3, %vm171_vm2  ;;  %vm107_vm10 = vcmp.eq.s32.totalorder %v87_v6, %v684_v8  ;;  %vm108_vm11 = vcmp.eq.s32.totalorder %v88_v7, %v684_v8  ;;  %vm167_vm13 = vcmp.eq.s32.totalorder %v87_v6, %v689_v9  ;;  %vm168_vm14 = vcmp.eq.s32.totalorder %v88_v7, %v689_v9 }
  0x2f   :  { %518 = vmatprep.subr.msk.bf16.mxu1 %vm462_vm9, %v640_v10  ;;  %499 = vmatpush3.bf16.msk.msra.mxu0 %vm444_vm4, %v640_v10  ;;  %vm446_vm12 = vmpackc.low %vm110_vm6, %vm109_vm5  ;;  %vm105_vm2 = vcmp.eq.s32.totalorder %v85_v11, %v684_v8  ;;  %vm106_vm3 = vcmp.eq.s32.totalorder %v86_v12, %v684_v8  ;;  %v83_v17 = vadd.s32 48, %v676_v1  ;;  %v84_v18 = vadd.s32 56, %v676_v1  ;;  %p617_p5 = pnand %p616_p4, %p610_p1 }
  0x30   :  { %519 = vmatpush3.bf16.msk.msra.mxu1 %vm462_vm9, %v640_v10  ;;  %500 = vmatprep.subr.msk.bf16.mxu0 %vm446_vm12, %v640_v10  ;;  %vm464_vm15 = vmpackc.low %vm170_vm8, %vm169_vm7  ;;  %vm165_vm4 = vcmp.eq.s32.totalorder %v85_v11, %v689_v9  ;;  %vm166_vm5 = vcmp.eq.s32.totalorder %v86_v12, %v689_v9  ;;  %v81_v21 = vadd.s32 32, %v676_v1  ;;  %v82_v22 = vadd.s32 40, %v676_v1 }
  0x31   :  { %520 = vmatprep.subr.msk.bf16.mxu1 %vm464_vm15, %v640_v10  ;;  %vm715_vm0 = vmpackc.low %vm108_vm11, %vm107_vm10  ;;  %vm103_vm8 = vcmp.eq.s32.totalorder %v83_v17, %v684_v8  ;;  %vm104_vm9 = vcmp.eq.s32.totalorder %v84_v18, %v684_v8  ;;  %vm163_vm10 = vcmp.eq.s32.totalorder %v83_v17, %v689_v9  ;;  %vm164_vm11 = vcmp.eq.s32.totalorder %v84_v18, %v689_v9 }
  0x32   :  { %vm719_vm1 = vmpackc.low %vm168_vm14, %vm167_vm13  ;;  %vm101_vm14 = vcmp.eq.s32.totalorder %v81_v21, %v684_v8  ;;  %v79_v25 = vadd.s32 16, %v676_v1  ;;  %v80_v26 = vadd.s32 24, %v676_v1  ;;  %v78_v28 = vadd.s32 8, %v676_v1 }
  0x33   :  { %501 = vmatpush3.bf16.msk.msra.mxu0 %vm446_vm12, %v640_v10  ;;  %vm737_vm6 = vmpackc.low %vm106_vm3, %vm105_vm2 }
  0x34   :  { %521 = vmatpush3.bf16.msk.msra.mxu1 %vm464_vm15, %v640_v10  ;;  %502 = vmatprep.subr.msk.bf16.mxu0 %vm715_vm0, %v640_v10  ;;  %vm741_vm7 = vmpackc.low %vm166_vm5, %vm165_vm4  ;;  %vm102_vm15 = vcmp.eq.s32.totalorder %v82_v22, %v684_v8  ;;  %vm99_vm4 = vcmp.eq.s32.totalorder %v79_v25, %v684_v8  ;;  %vm100_vm5 = vcmp.eq.s32.totalorder %v80_v26, %v684_v8 }
  0x35   :  { %522 = vmatprep.subr.msk.bf16.mxu1 %vm719_vm1, %v640_v10  ;;  %vm763_vm12 = vmpackc.low %vm104_vm9, %vm103_vm8 }
  0x36   :  { %vm767_vm13 = vmpackc.low %vm164_vm11, %vm163_vm10  ;;  %vm97_vm10 = vcmp.eq.s32.totalorder %v676_v1, %v684_v8  ;;  %vm98_vm11 = vcmp.eq.s32.totalorder %v78_v28, %v684_v8 }
  0x37   :  { %503 = vmatpush3.bf16.msk.msra.mxu0 %vm715_vm0, %v640_v10  ;;  %vm161_vm0 = vcmp.eq.s32.totalorder %v81_v21, %v689_v9  ;;  %vm454_vm2 = vmpackc.low %vm102_vm15, %vm101_vm14 }
  0x38   :  { %523 = vmatpush3.bf16.msk.msra.mxu1 %vm719_vm1, %v640_v10  ;;  %504 = vmatprep.subr.msk.bf16.mxu0 %vm737_vm6, %v640_v10  ;;  %vm162_vm1 = vcmp.eq.s32.totalorder %v82_v22, %v689_v9  ;;  %vm456_vm8 = vmpackc.low %vm100_vm5, %vm99_vm4 }
  0x39   :  { %524 = vmatprep.subr.msk.bf16.mxu1 %vm741_vm7, %v640_v10  ;;  %vm789_vm3 = vmpackc.low %vm162_vm1, %vm161_vm0 }
  0x3a   :  { %vm458_vm14 = vmpackc.low %vm98_vm11, %vm97_vm10 }
  0x3b   :  { %505 = vmatpush3.bf16.msk.msra.mxu0 %vm737_vm6, %v640_v10  ;;  %vm159_vm6 = vcmp.eq.s32.totalorder %v79_v25, %v689_v9 }
  0x3c   :  { %525 = vmatpush3.bf16.msk.msra.mxu1 %vm741_vm7, %v640_v10  ;;  %506 = vmatprep.subr.msk.bf16.mxu0 %vm763_vm12, %v640_v10  ;;  %vm160_vm7 = vcmp.eq.s32.totalorder %v80_v26, %v689_v9 }
  0x3d   :  { %526 = vmatprep.subr.msk.bf16.mxu1 %vm767_vm13, %v640_v10  ;;  %vm474_vm9 = vmpackc.low %vm160_vm7, %vm159_vm6 }
  0x3f   :  { %507 = vmatpush3.bf16.msk.msra.mxu0 %vm763_vm12, %v640_v10  ;;  %vm157_vm12 = vcmp.eq.s32.totalorder %v676_v1, %v689_v9 }
  0x40   :  { %527 = vmatpush3.bf16.msk.msra.mxu1 %vm767_vm13, %v640_v10  ;;  %508 = vmatprep.subr.msk.bf16.mxu0 %vm454_vm2, %v640_v10  ;;  %vm158_vm13 = vcmp.eq.s32.totalorder %v78_v28, %v689_v9 }
  0x41   :  { %528 = vmatprep.subr.msk.bf16.mxu1 %vm789_vm3, %v640_v10  ;;  %vm476_vm15 = vmpackc.low %vm158_vm13, %vm157_vm12 }
  0x43   :  { %509 = vmatpush3.bf16.msk.msra.mxu0 %vm454_vm2, %v640_v10 }
  0x44   :  { %529 = vmatpush3.bf16.msk.msra.mxu1 %vm789_vm3, %v640_v10  ;;  %510 = vmatprep.subr.msk.bf16.mxu0 %vm456_vm8, %v640_v10 }
  0x45   :  { %530 = vmatprep.subr.msk.bf16.mxu1 %vm474_vm9, %v640_v10 }
  0x47   :  { %511 = vmatpush3.bf16.msk.msra.mxu0 %vm456_vm8, %v640_v10 }
  0x48   :  { %531 = vmatpush3.bf16.msk.msra.mxu1 %vm474_vm9, %v640_v10  ;;  %512 = vmatprep.subr.msk.bf16.mxu0 %vm458_vm14, %v640_v10 }
  0x49   :  { %532 = vmatprep.subr.msk.bf16.mxu1 %vm476_vm15, %v640_v10 }
  0x4b   :  { %513 = vmatpush3.bf16.msk.msra.mxu0 %vm458_vm14, %v640_v10 }
  0x4c   :  { %533 = vmatpush3.bf16.msk.msra.mxu1 %vm476_vm15, %v640_v10 }
  0x4e   :  { %515 = vmatmul.mubr.bf16.vlgmr.msra.gmra.mxu0 %v547_v29 }
  0x4f   :  { %535 = vmatmul.mubr.bf16.vlgmr.msra.gmra.mxu1 %v548_v30 }
 0x10e   :  { %v516_v31 = vpop.f32.mrf.mxu0 }
 0x10f   :  { %v536_v32 = vpop.f32.mrf.mxu1 }
 0x110   :  { %v267_v33 = vpop.f32.mrf.mxu0  ;;  %v380_v41 = vmul.f32 %v536_v32, %v516_v31 }
 0x111   :  { %v344_v34 = vpop.f32.mrf.mxu1 }
 0x112   :  { %v517_v35 = vpop.f32.mrf.mxu0  ;;  %v378_v39 = vmul.f32 %v344_v34, %v267_v33 }
 0x113   :  { %v537_v36 = vpop.f32.mrf.mxu1 }
 0x114   :  { %v270_v37 = vpop.f32.mrf.mxu0  ;;  %v381_v43 = vmul.f32 %v537_v36, %v517_v35 }
 0x115   :  { %v347_v38 = vpop.f32.mrf.mxu1 }
 0x116   :  { %v379_v40 = vmul.f32 %v347_v38, %v270_v37 }
 0x118   :  { %v382_v42 = vadd.f32 %v379_v40, %v378_v39 }
 0x11a   :  { %v383_v44 = vadd.f32 %v382_v42, %v380_v41 }
 0x11c   :  { %v384_v45 = vadd.f32 %v383_v44, %v381_v43 }
 0x11e   :  { %v385_v46 = vrot.slane %v384_v45, 4 }
 0x120   :  { %v386_v47 = vadd.f32 %v385_v46, %v384_v45 }
 0x122   :  { %v387_v48 = vrot.slane %v386_v47, 2 }
 0x124   :  { %v388_v49 = vadd.f32 %v387_v48, %v386_v47 }
 0x126   :  { %v389_v50 = vrot.slane %v388_v49, 1 }
 0x128   :  { %v390_v51 = vadd.f32 %v389_v50, %v388_v49 }
 0x12a   :  { %391 = vst [vmem:[#allocation10] sm:$0x1] %v390_v51 }
 0x12b   :  { %620 = shalt.err (!%p617_p5)
}
 0x12c   :  { %401 = dma.vmem_to_hbm [thread:$0]  %s399_s6, 16, %s833_s4, [#allocation6]  }
 0x12d   :  { %633 = dma.done.wait [#allocation6], 16  }
 0x12e   :  { %634 = vsyncadd [#allocation6], 4294967280 }
 0x12f   :  { %405 = vsyncpa [#allocation5], 1 }
 0x130   :  { %406 = vsyncpa [#allocation8], 1 }
 0x131   :  { %407 = vsyncpa [#allocation6], 1 }

</bundles_post_ra>
